<compile_context>
chip_gen: v7x
topology: tpu7x:2x2x1
jax: 0.10.0
libtpu: 0.0.40
codegen_flags: <defaults>
</compile_context>

<pallas_src>
import jax
import jax.numpy as jnp
from jax.experimental import pallas as pl
from jax.experimental.pallas import tpu as pltpu


def _cdiv(a, b):
    return -(-a // b)


def _round_up(a, b):
    return _cdiv(a, b) * b


def _pick_tiling(C, s_max=32):
    """Choose (S, grid) for the (..., C, 128) nt layout.

    S (sublane extent of one block) must be a multiple of 8 or equal the full
    dim C.  Mid-size problems are split into two equal blocks so both v7x
    TensorCores get work; large problems use S = s_max and a growing grid.
    """
    if C <= s_max:
        if C >= 16 and C % 16 == 0:
            return C // 2, 2          # two equal blocks -> 2-TC balance (v7x)
        return C, 1                   # single block (S == full dim is allowed)
    return s_max, _cdiv(C, s_max)


def _make_evreg_kernel(K, p):
    def kernel(params_ref, xT_ref, out_ref):
        # params_ref : SMEM ((4 + 2*p) * K,) flat scalar table
        #              row 0: eta^2  row 1: gamma^2  row 2: sig^2  row 3: alpha
        #              rows 4..4+p-1    : w^T    (w[k, j]    at row 4+j,   col k)
        #              rows 4+p..4+2p-1 : beta^T (beta[k, j] at row 4+p+j, col k)
        # xT_ref     : VMEM (p, S, 128) input tile (nt over sublanes + lanes)
        # out_ref    : VMEM (3, S, 128) rows = [mux, sig2x, hx]
        def prm(row, k):
            return params_ref[row * K + k]          # scalar SMEM load

        # d2[k] = ||x - w_k||^2 and mu[k] = x . beta_k, accumulated feature by
        # feature; every op is a dense (S,128) VPU op with a scalar operand.
        d2 = [None] * K
        mu = [None] * K
        for j in range(p):
            xj = xT_ref[j]                           # (S, 128) dense vregs
            for k in range(K):
                diff = xj - prm(4 + j, k)
                sq = diff * diff
                d2[k] = sq if d2[k] is None else d2[k] + sq
                xb = xj * prm(4 + p + j, k)
                mu[k] = xb if mu[k] is None else mu[k] + xb

        hx = None
        num_mu = None
        num_s = None
        for k in range(K):
            a_k = jnp.exp(-prm(1, k) * d2[k])        # (S,128) EUP, dense
            aH_k = prm(0, k) * a_k                   # a * h
            mu_k = mu[k] + prm(3, k)                 # x.beta_k + alpha_k
            t_mu = mu_k * aH_k
            t_s = prm(2, k) * (aH_k * aH_k)          # sig^2 * a^2 * h^2
            if hx is None:
                hx, num_mu, num_s = aH_k, t_mu, t_s
            else:
                hx = hx + aH_k
                num_mu = num_mu + t_mu
                num_s = num_s + t_s

        hx = jnp.maximum(hx, 1e-8)
        inv = pl.reciprocal(hx, approx=True)         # EUP slot
        inv = inv * (2.0 - hx * inv)                 # one Newton step -> f32 acc.
        out_ref[0] = num_mu * inv                    # mux
        out_ref[1] = num_s * (inv * inv)             # sig2x
        out_ref[2] = hx                              # hx

    return kernel


def evreg_forward(x, alpha, beta, sig, eta, gamma, w, *, sublane_tile=32):
    """Pallas TPU implementation of Evreg.forward.

    x: (nt, p); alpha, sig, eta: (1, K); beta, w: (K, p); gamma: (K, 1).
    Returns dict with 'mux', 'sig2x', 'hx' (each (nt,) float32).
    """
    nt, p = x.shape
    K = alpha.shape[1]

    C = _cdiv(max(nt, 1), 128)
    S, grid = _pick_tiling(C, sublane_tile)
    C_pad = S * grid
    nt_pad = C_pad * 128

    # Layout plumbing: nt onto lanes, split into 128-wide chunks over sublanes.
    # TODO(synk): for a fully HBM-roofline end-to-end path the producer should
    # emit x already in (p, nt) layout (or XLA should fuse this transpose into
    # x's producer under jit); an in-kernel relayout is not worth it here.
    xT = jnp.transpose(x.astype(jnp.float32))                     # (p, nt)
    xT = jnp.pad(xT, ((0, 0), (0, nt_pad - nt)))                  # (p, nt_pad)
    x3 = xT.reshape(p, C_pad, 128)

    # Hoisted tile-invariant parameter math, packed into one flat SMEM table.
    params = jnp.concatenate(
        [eta * eta,                       # row 0 : h = eta^2
         jnp.transpose(gamma) ** 2,       # row 1 : gamma^2
         sig * sig,                       # row 2 : sig^2
         alpha,                           # row 3 : alpha
         jnp.transpose(w),                # rows 4 .. 4+p-1     : w^T
         jnp.transpose(beta)],            # rows 4+p .. 4+2p-1  : beta^T
        axis=0).astype(jnp.float32).reshape(-1)                   # ((4+2p)*K,)

    out = pl.pallas_call(
        _make_evreg_kernel(K, p),
        out_shape=jax.ShapeDtypeStruct((3, C_pad, 128), jnp.float32),
        grid_spec=pltpu.PrefetchScalarGridSpec(
            num_scalar_prefetch=0,
            grid=(grid,),
            in_specs=[
                pl.BlockSpec(memory_space=pltpu.MemorySpace.SMEM),   # params
                pl.BlockSpec((p, S, 128), lambda i: (0, i, 0)),      # x tile
            ],
            out_specs=pl.BlockSpec((3, S, 128), lambda i: (0, i, 0)),
        ),
        compiler_params=pltpu.CompilerParams(
            dimension_semantics=("parallel",)),
    )(params, x3)

    out2 = out.reshape(3, nt_pad)
    return {"mux": out2[0, :nt], "sig2x": out2[1, :nt], "hx": out2[2, :nt]}


def evreg_forward_ref(x, alpha, beta, sig, eta, gamma, w):
    """Pure-JAX reference mirroring the PyTorch forward."""
    h = eta ** 2                                                   # (1, K)
    d2 = jnp.sum((x[:, None, :] - w[None, :, :]) ** 2, axis=2)     # (nt, K)
    a = jnp.exp(-(gamma[:, 0] ** 2)[None, :] * d2)                 # (nt, K)
    hx = jnp.clip(jnp.sum(a * h, axis=1), 1e-8)
    mu = x @ beta.T + alpha
    mux = jnp.sum(mu * a * h, axis=1) / hx
    sig2x = jnp.sum((sig ** 2) * (a ** 2) * (h ** 2), axis=1) / (hx ** 2)
    return {"mux": mux, "sig2x": sig2x, "hx": hx}


# TODO(synk): loss/fit/ENNreg_init_kmeans/evreg_evaluation (Normal CDFs, KMeans
# init, Adam training loop, pandas/pycox metrics) are host-side training
# utilities and are intentionally not kernelized.

if __name__ == "__main__":
    # Shapes consistent with the module: input_dim=8, prototype_dim=4.
    input_dim, prototype_dim = 8, 4

    def make_inputs(nt, seed=0):
        key = jax.random.PRNGKey(seed)
        k_x, k_a, k_b, k_s, k_e, k_g, k_w = jax.random.split(key, 7)
        x     = jax.random.normal(k_x, (nt, input_dim), jnp.float32)
        alpha = jax.random.normal(k_a, (1, prototype_dim), jnp.float32) * 0.5
        beta  = jax.random.normal(k_b, (prototype_dim, input_dim), jnp.float32) * 0.1
        sig   = jax.random.normal(k_s, (1, prototype_dim), jnp.float32) * 0.3 + 1.0
        eta   = jax.random.normal(k_e, (1, prototype_dim), jnp.float32) * 0.2 + 1.4
        gamma = jax.random.normal(k_g, (prototype_dim, 1), jnp.float32) * 0.2 + 0.7
        w     = jax.random.normal(k_w, (prototype_dim, input_dim), jnp.float32)
        return x, alpha, beta, sig, eta, gamma, w

    fwd = jax.jit(evreg_forward)

    # nt=16   -> single tiny block;
    # nt=2500 -> one (p,20,128) block (padding only to 128 granularity);
    # nt=9000 -> multi-step grid (S=32, grid=3) exercising block-level padding.
    for nt in (16, 2500, 9000):
        args = make_inputs(nt)
        out = fwd(*args)
        jax.block_until_ready(out)
        ref = evreg_forward_ref(*args)
        for name in ("mux", "sig2x", "hx"):
            assert out[name].shape == (nt,), (name, out[name].shape)
            assert jnp.allclose(out[name], ref[name], rtol=1e-4, atol=1e-5), name

    print("KERNEL_OK")
</pallas_src>

<mosaic_0001>
module attributes {stable_mosaic.version = 11 : i64} {
  func.func @kernel(%arg0: i32, %arg1: memref<80xf32, #tpu.memory_space<smem>>, %arg2: memref<8x1x128xf32, #tpu.memory_space<vmem>>, %arg3: memref<3x1x128xf32, #tpu.memory_space<vmem>>) attributes {dimension_semantics = [#tpu.dimension_semantics<parallel>], iteration_bounds = array<i64: 1>, scalar_prefetch = 0 : i64, scratch_operands = 0 : i64, tpu.core_type = #tpu.core_type<tc>, window_params = [{transform_indices = @transform_0, window_bounds = array<i64: 80>}, {transform_indices = @transform_1, window_bounds = array<i64: 8, 1, 128>}, {transform_indices = @transform_2, window_bounds = array<i64: 3, 1, 128>}]} {
    %c0 = arith.constant 0 : index
    %c0_0 = arith.constant 0 : index
    %c0_1 = arith.constant 0 : index
    %0 = vector.load %arg2[%c0, %c0_0, %c0_1] : memref<8x1x128xf32, #tpu.memory_space<vmem>>, vector<1x1x128xf32>
    %1 = vector.shape_cast %0 : vector<1x1x128xf32> to vector<1x128xf32>
    %c16 = arith.constant 16 : index
    %2 = memref.load %arg1[%c16] : memref<80xf32, #tpu.memory_space<smem>>
    %3 = vector.broadcast %2 : f32 to vector<1x128xf32>
    %4 = arith.subf %1, %3 : vector<1x128xf32>
    %5 = arith.mulf %4, %4 : vector<1x128xf32>
    %c48 = arith.constant 48 : index
    %6 = memref.load %arg1[%c48] : memref<80xf32, #tpu.memory_space<smem>>
    %7 = vector.broadcast %6 : f32 to vector<1x128xf32>
    %8 = arith.mulf %1, %7 : vector<1x128xf32>
    %c17 = arith.constant 17 : index
    %9 = memref.load %arg1[%c17] : memref<80xf32, #tpu.memory_space<smem>>
    %10 = vector.broadcast %9 : f32 to vector<1x128xf32>
    %11 = arith.subf %1, %10 : vector<1x128xf32>
    %12 = arith.mulf %11, %11 : vector<1x128xf32>
    %c49 = arith.constant 49 : index
    %13 = memref.load %arg1[%c49] : memref<80xf32, #tpu.memory_space<smem>>
    %14 = vector.broadcast %13 : f32 to vector<1x128xf32>
    %15 = arith.mulf %1, %14 : vector<1x128xf32>
    %c18 = arith.constant 18 : index
    %16 = memref.load %arg1[%c18] : memref<80xf32, #tpu.memory_space<smem>>
    %17 = vector.broadcast %16 : f32 to vector<1x128xf32>
    %18 = arith.subf %1, %17 : vector<1x128xf32>
    %19 = arith.mulf %18, %18 : vector<1x128xf32>
    %c50 = arith.constant 50 : index
    %20 = memref.load %arg1[%c50] : memref<80xf32, #tpu.memory_space<smem>>
    %21 = vector.broadcast %20 : f32 to vector<1x128xf32>
    %22 = arith.mulf %1, %21 : vector<1x128xf32>
    %c19 = arith.constant 19 : index
    %23 = memref.load %arg1[%c19] : memref<80xf32, #tpu.memory_space<smem>>
    %24 = vector.broadcast %23 : f32 to vector<1x128xf32>
    %25 = arith.subf %1, %24 : vector<1x128xf32>
    %26 = arith.mulf %25, %25 : vector<1x128xf32>
    %c51 = arith.constant 51 : index
    %27 = memref.load %arg1[%c51] : memref<80xf32, #tpu.memory_space<smem>>
    %28 = vector.broadcast %27 : f32 to vector<1x128xf32>
    %29 = arith.mulf %1, %28 : vector<1x128xf32>
    %c1 = arith.constant 1 : index
    %c0_2 = arith.constant 0 : index
    %c0_3 = arith.constant 0 : index
    %30 = vector.load %arg2[%c1, %c0_2, %c0_3] : memref<8x1x128xf32, #tpu.memory_space<vmem>>, vector<1x1x128xf32>
    %31 = vector.shape_cast %30 : vector<1x1x128xf32> to vector<1x128xf32>
    %c20 = arith.constant 20 : index
    %32 = memref.load %arg1[%c20] : memref<80xf32, #tpu.memory_space<smem>>
    %33 = vector.broadcast %32 : f32 to vector<1x128xf32>
    %34 = arith.subf %31, %33 : vector<1x128xf32>
    %35 = arith.mulf %34, %34 : vector<1x128xf32>
    %36 = arith.addf %5, %35 : vector<1x128xf32>
    %c52 = arith.constant 52 : index
    %37 = memref.load %arg1[%c52] : memref<80xf32, #tpu.memory_space<smem>>
    %38 = vector.broadcast %37 : f32 to vector<1x128xf32>
    %39 = arith.mulf %31, %38 : vector<1x128xf32>
    %40 = arith.addf %8, %39 : vector<1x128xf32>
    %c21 = arith.constant 21 : index
    %41 = memref.load %arg1[%c21] : memref<80xf32, #tpu.memory_space<smem>>
    %42 = vector.broadcast %41 : f32 to vector<1x128xf32>
    %43 = arith.subf %31, %42 : vector<1x128xf32>
    %44 = arith.mulf %43, %43 : vector<1x128xf32>
    %45 = arith.addf %12, %44 : vector<1x128xf32>
    %c53 = arith.constant 53 : index
    %46 = memref.load %arg1[%c53] : memref<80xf32, #tpu.memory_space<smem>>
    %47 = vector.broadcast %46 : f32 to vector<1x128xf32>
    %48 = arith.mulf %31, %47 : vector<1x128xf32>
    %49 = arith.addf %15, %48 : vector<1x128xf32>
    %c22 = arith.constant 22 : index
    %50 = memref.load %arg1[%c22] : memref<80xf32, #tpu.memory_space<smem>>
    %51 = vector.broadcast %50 : f32 to vector<1x128xf32>
    %52 = arith.subf %31, %51 : vector<1x128xf32>
    %53 = arith.mulf %52, %52 : vector<1x128xf32>
    %54 = arith.addf %19, %53 : vector<1x128xf32>
    %c54 = arith.constant 54 : index
    %55 = memref.load %arg1[%c54] : memref<80xf32, #tpu.memory_space<smem>>
    %56 = vector.broadcast %55 : f32 to vector<1x128xf32>
    %57 = arith.mulf %31, %56 : vector<1x128xf32>
    %58 = arith.addf %22, %57 : vector<1x128xf32>
    %c23 = arith.constant 23 : index
    %59 = memref.load %arg1[%c23] : memref<80xf32, #tpu.memory_space<smem>>
    %60 = vector.broadcast %59 : f32 to vector<1x128xf32>
    %61 = arith.subf %31, %60 : vector<1x128xf32>
    %62 = arith.mulf %61, %61 : vector<1x128xf32>
    %63 = arith.addf %26, %62 : vector<1x128xf32>
    %c55 = arith.constant 55 : index
    %64 = memref.load %arg1[%c55] : memref<80xf32, #tpu.memory_space<smem>>
    %65 = vector.broadcast %64 : f32 to vector<1x128xf32>
    %66 = arith.mulf %31, %65 : vector<1x128xf32>
    %67 = arith.addf %29, %66 : vector<1x128xf32>
    %c2 = arith.constant 2 : index
    %c0_4 = arith.constant 0 : index
    %c0_5 = arith.constant 0 : index
    %68 = vector.load %arg2[%c2, %c0_4, %c0_5] : memref<8x1x128xf32, #tpu.memory_space<vmem>>, vector<1x1x128xf32>
    %69 = vector.shape_cast %68 : vector<1x1x128xf32> to vector<1x128xf32>
    %c24 = arith.constant 24 : index
    %70 = memref.load %arg1[%c24] : memref<80xf32, #tpu.memory_space<smem>>
    %71 = vector.broadcast %70 : f32 to vector<1x128xf32>
    %72 = arith.subf %69, %71 : vector<1x128xf32>
    %73 = arith.mulf %72, %72 : vector<1x128xf32>
    %74 = arith.addf %36, %73 : vector<1x128xf32>
    %c56 = arith.constant 56 : index
    %75 = memref.load %arg1[%c56] : memref<80xf32, #tpu.memory_space<smem>>
    %76 = vector.broadcast %75 : f32 to vector<1x128xf32>
    %77 = arith.mulf %69, %76 : vector<1x128xf32>
    %78 = arith.addf %40, %77 : vector<1x128xf32>
    %c25 = arith.constant 25 : index
    %79 = memref.load %arg1[%c25] : memref<80xf32, #tpu.memory_space<smem>>
    %80 = vector.broadcast %79 : f32 to vector<1x128xf32>
    %81 = arith.subf %69, %80 : vector<1x128xf32>
    %82 = arith.mulf %81, %81 : vector<1x128xf32>
    %83 = arith.addf %45, %82 : vector<1x128xf32>
    %c57 = arith.constant 57 : index
    %84 = memref.load %arg1[%c57] : memref<80xf32, #tpu.memory_space<smem>>
    %85 = vector.broadcast %84 : f32 to vector<1x128xf32>
    %86 = arith.mulf %69, %85 : vector<1x128xf32>
    %87 = arith.addf %49, %86 : vector<1x128xf32>
    %c26 = arith.constant 26 : index
    %88 = memref.load %arg1[%c26] : memref<80xf32, #tpu.memory_space<smem>>
    %89 = vector.broadcast %88 : f32 to vector<1x128xf32>
    %90 = arith.subf %69, %89 : vector<1x128xf32>
    %91 = arith.mulf %90, %90 : vector<1x128xf32>
    %92 = arith.addf %54, %91 : vector<1x128xf32>
    %c58 = arith.constant 58 : index
    %93 = memref.load %arg1[%c58] : memref<80xf32, #tpu.memory_space<smem>>
    %94 = vector.broadcast %93 : f32 to vector<1x128xf32>
    %95 = arith.mulf %69, %94 : vector<1x128xf32>
    %96 = arith.addf %58, %95 : vector<1x128xf32>
    %c27 = arith.constant 27 : index
    %97 = memref.load %arg1[%c27] : memref<80xf32, #tpu.memory_space<smem>>
    %98 = vector.broadcast %97 : f32 to vector<1x128xf32>
    %99 = arith.subf %69, %98 : vector<1x128xf32>
    %100 = arith.mulf %99, %99 : vector<1x128xf32>
    %101 = arith.addf %63, %100 : vector<1x128xf32>
    %c59 = arith.constant 59 : index
    %102 = memref.load %arg1[%c59] : memref<80xf32, #tpu.memory_space<smem>>
    %103 = vector.broadcast %102 : f32 to vector<1x128xf32>
    %104 = arith.mulf %69, %103 : vector<1x128xf32>
    %105 = arith.addf %67, %104 : vector<1x128xf32>
    %c3 = arith.constant 3 : index
    %c0_6 = arith.constant 0 : index
    %c0_7 = arith.constant 0 : index
    %106 = vector.load %arg2[%c3, %c0_6, %c0_7] : memref<8x1x128xf32, #tpu.memory_space<vmem>>, vector<1x1x128xf32>
    %107 = vector.shape_cast %106 : vector<1x1x128xf32> to vector<1x128xf32>
    %c28 = arith.constant 28 : index
    %108 = memref.load %arg1[%c28] : memref<80xf32, #tpu.memory_space<smem>>
    %109 = vector.broadcast %108 : f32 to vector<1x128xf32>
    %110 = arith.subf %107, %109 : vector<1x128xf32>
    %111 = arith.mulf %110, %110 : vector<1x128xf32>
    %112 = arith.addf %74, %111 : vector<1x128xf32>
    %c60 = arith.constant 60 : index
    %113 = memref.load %arg1[%c60] : memref<80xf32, #tpu.memory_space<smem>>
    %114 = vector.broadcast %113 : f32 to vector<1x128xf32>
    %115 = arith.mulf %107, %114 : vector<1x128xf32>
    %116 = arith.addf %78, %115 : vector<1x128xf32>
    %c29 = arith.constant 29 : index
    %117 = memref.load %arg1[%c29] : memref<80xf32, #tpu.memory_space<smem>>
    %118 = vector.broadcast %117 : f32 to vector<1x128xf32>
    %119 = arith.subf %107, %118 : vector<1x128xf32>
    %120 = arith.mulf %119, %119 : vector<1x128xf32>
    %121 = arith.addf %83, %120 : vector<1x128xf32>
    %c61 = arith.constant 61 : index
    %122 = memref.load %arg1[%c61] : memref<80xf32, #tpu.memory_space<smem>>
    %123 = vector.broadcast %122 : f32 to vector<1x128xf32>
    %124 = arith.mulf %107, %123 : vector<1x128xf32>
    %125 = arith.addf %87, %124 : vector<1x128xf32>
    %c30 = arith.constant 30 : index
    %126 = memref.load %arg1[%c30] : memref<80xf32, #tpu.memory_space<smem>>
    %127 = vector.broadcast %126 : f32 to vector<1x128xf32>
    %128 = arith.subf %107, %127 : vector<1x128xf32>
    %129 = arith.mulf %128, %128 : vector<1x128xf32>
    %130 = arith.addf %92, %129 : vector<1x128xf32>
    %c62 = arith.constant 62 : index
    %131 = memref.load %arg1[%c62] : memref<80xf32, #tpu.memory_space<smem>>
    %132 = vector.broadcast %131 : f32 to vector<1x128xf32>
    %133 = arith.mulf %107, %132 : vector<1x128xf32>
    %134 = arith.addf %96, %133 : vector<1x128xf32>
    %c31 = arith.constant 31 : index
    %135 = memref.load %arg1[%c31] : memref<80xf32, #tpu.memory_space<smem>>
    %136 = vector.broadcast %135 : f32 to vector<1x128xf32>
    %137 = arith.subf %107, %136 : vector<1x128xf32>
    %138 = arith.mulf %137, %137 : vector<1x128xf32>
    %139 = arith.addf %101, %138 : vector<1x128xf32>
    %c63 = arith.constant 63 : index
    %140 = memref.load %arg1[%c63] : memref<80xf32, #tpu.memory_space<smem>>
    %141 = vector.broadcast %140 : f32 to vector<1x128xf32>
    %142 = arith.mulf %107, %141 : vector<1x128xf32>
    %143 = arith.addf %105, %142 : vector<1x128xf32>
    %c4 = arith.constant 4 : index
    %c0_8 = arith.constant 0 : index
    %c0_9 = arith.constant 0 : index
    %144 = vector.load %arg2[%c4, %c0_8, %c0_9] : memref<8x1x128xf32, #tpu.memory_space<vmem>>, vector<1x1x128xf32>
    %145 = vector.shape_cast %144 : vector<1x1x128xf32> to vector<1x128xf32>
    %c32 = arith.constant 32 : index
    %146 = memref.load %arg1[%c32] : memref<80xf32, #tpu.memory_space<smem>>
    %147 = vector.broadcast %146 : f32 to vector<1x128xf32>
    %148 = arith.subf %145, %147 : vector<1x128xf32>
    %149 = arith.mulf %148, %148 : vector<1x128xf32>
    %150 = arith.addf %112, %149 : vector<1x128xf32>
    %c64 = arith.constant 64 : index
    %151 = memref.load %arg1[%c64] : memref<80xf32, #tpu.memory_space<smem>>
    %152 = vector.broadcast %151 : f32 to vector<1x128xf32>
    %153 = arith.mulf %145, %152 : vector<1x128xf32>
    %154 = arith.addf %116, %153 : vector<1x128xf32>
    %c33 = arith.constant 33 : index
    %155 = memref.load %arg1[%c33] : memref<80xf32, #tpu.memory_space<smem>>
    %156 = vector.broadcast %155 : f32 to vector<1x128xf32>
    %157 = arith.subf %145, %156 : vector<1x128xf32>
    %158 = arith.mulf %157, %157 : vector<1x128xf32>
    %159 = arith.addf %121, %158 : vector<1x128xf32>
    %c65 = arith.constant 65 : index
    %160 = memref.load %arg1[%c65] : memref<80xf32, #tpu.memory_space<smem>>
    %161 = vector.broadcast %160 : f32 to vector<1x128xf32>
    %162 = arith.mulf %145, %161 : vector<1x128xf32>
    %163 = arith.addf %125, %162 : vector<1x128xf32>
    %c34 = arith.constant 34 : index
    %164 = memref.load %arg1[%c34] : memref<80xf32, #tpu.memory_space<smem>>
    %165 = vector.broadcast %164 : f32 to vector<1x128xf32>
    %166 = arith.subf %145, %165 : vector<1x128xf32>
    %167 = arith.mulf %166, %166 : vector<1x128xf32>
    %168 = arith.addf %130, %167 : vector<1x128xf32>
    %c66 = arith.constant 66 : index
    %169 = memref.load %arg1[%c66] : memref<80xf32, #tpu.memory_space<smem>>
    %170 = vector.broadcast %169 : f32 to vector<1x128xf32>
    %171 = arith.mulf %145, %170 : vector<1x128xf32>
    %172 = arith.addf %134, %171 : vector<1x128xf32>
    %c35 = arith.constant 35 : index
    %173 = memref.load %arg1[%c35] : memref<80xf32, #tpu.memory_space<smem>>
    %174 = vector.broadcast %173 : f32 to vector<1x128xf32>
    %175 = arith.subf %145, %174 : vector<1x128xf32>
    %176 = arith.mulf %175, %175 : vector<1x128xf32>
    %177 = arith.addf %139, %176 : vector<1x128xf32>
    %c67 = arith.constant 67 : index
    %178 = memref.load %arg1[%c67] : memref<80xf32, #tpu.memory_space<smem>>
    %179 = vector.broadcast %178 : f32 to vector<1x128xf32>
    %180 = arith.mulf %145, %179 : vector<1x128xf32>
    %181 = arith.addf %143, %180 : vector<1x128xf32>
    %c5 = arith.constant 5 : index
    %c0_10 = arith.constant 0 : index
    %c0_11 = arith.constant 0 : index
    %182 = vector.load %arg2[%c5, %c0_10, %c0_11] : memref<8x1x128xf32, #tpu.memory_space<vmem>>, vector<1x1x128xf32>
    %183 = vector.shape_cast %182 : vector<1x1x128xf32> to vector<1x128xf32>
    %c36 = arith.constant 36 : index
    %184 = memref.load %arg1[%c36] : memref<80xf32, #tpu.memory_space<smem>>
    %185 = vector.broadcast %184 : f32 to vector<1x128xf32>
    %186 = arith.subf %183, %185 : vector<1x128xf32>
    %187 = arith.mulf %186, %186 : vector<1x128xf32>
    %188 = arith.addf %150, %187 : vector<1x128xf32>
    %c68 = arith.constant 68 : index
    %189 = memref.load %arg1[%c68] : memref<80xf32, #tpu.memory_space<smem>>
    %190 = vector.broadcast %189 : f32 to vector<1x128xf32>
    %191 = arith.mulf %183, %190 : vector<1x128xf32>
    %192 = arith.addf %154, %191 : vector<1x128xf32>
    %c37 = arith.constant 37 : index
    %193 = memref.load %arg1[%c37] : memref<80xf32, #tpu.memory_space<smem>>
    %194 = vector.broadcast %193 : f32 to vector<1x128xf32>
    %195 = arith.subf %183, %194 : vector<1x128xf32>
    %196 = arith.mulf %195, %195 : vector<1x128xf32>
    %197 = arith.addf %159, %196 : vector<1x128xf32>
    %c69 = arith.constant 69 : index
    %198 = memref.load %arg1[%c69] : memref<80xf32, #tpu.memory_space<smem>>
    %199 = vector.broadcast %198 : f32 to vector<1x128xf32>
    %200 = arith.mulf %183, %199 : vector<1x128xf32>
    %201 = arith.addf %163, %200 : vector<1x128xf32>
    %c38 = arith.constant 38 : index
    %202 = memref.load %arg1[%c38] : memref<80xf32, #tpu.memory_space<smem>>
    %203 = vector.broadcast %202 : f32 to vector<1x128xf32>
    %204 = arith.subf %183, %203 : vector<1x128xf32>
    %205 = arith.mulf %204, %204 : vector<1x128xf32>
    %206 = arith.addf %168, %205 : vector<1x128xf32>
    %c70 = arith.constant 70 : index
    %207 = memref.load %arg1[%c70] : memref<80xf32, #tpu.memory_space<smem>>
    %208 = vector.broadcast %207 : f32 to vector<1x128xf32>
    %209 = arith.mulf %183, %208 : vector<1x128xf32>
    %210 = arith.addf %172, %209 : vector<1x128xf32>
    %c39 = arith.constant 39 : index
    %211 = memref.load %arg1[%c39] : memref<80xf32, #tpu.memory_space<smem>>
    %212 = vector.broadcast %211 : f32 to vector<1x128xf32>
    %213 = arith.subf %183, %212 : vector<1x128xf32>
    %214 = arith.mulf %213, %213 : vector<1x128xf32>
    %215 = arith.addf %177, %214 : vector<1x128xf32>
    %c71 = arith.constant 71 : index
    %216 = memref.load %arg1[%c71] : memref<80xf32, #tpu.memory_space<smem>>
    %217 = vector.broadcast %216 : f32 to vector<1x128xf32>
    %218 = arith.mulf %183, %217 : vector<1x128xf32>
    %219 = arith.addf %181, %218 : vector<1x128xf32>
    %c6 = arith.constant 6 : index
    %c0_12 = arith.constant 0 : index
    %c0_13 = arith.constant 0 : index
    %220 = vector.load %arg2[%c6, %c0_12, %c0_13] : memref<8x1x128xf32, #tpu.memory_space<vmem>>, vector<1x1x128xf32>
    %221 = vector.shape_cast %220 : vector<1x1x128xf32> to vector<1x128xf32>
    %c40 = arith.constant 40 : index
    %222 = memref.load %arg1[%c40] : memref<80xf32, #tpu.memory_space<smem>>
    %223 = vector.broadcast %222 : f32 to vector<1x128xf32>
    %224 = arith.subf %221, %223 : vector<1x128xf32>
    %225 = arith.mulf %224, %224 : vector<1x128xf32>
    %226 = arith.addf %188, %225 : vector<1x128xf32>
    %c72 = arith.constant 72 : index
    %227 = memref.load %arg1[%c72] : memref<80xf32, #tpu.memory_space<smem>>
    %228 = vector.broadcast %227 : f32 to vector<1x128xf32>
    %229 = arith.mulf %221, %228 : vector<1x128xf32>
    %230 = arith.addf %192, %229 : vector<1x128xf32>
    %c41 = arith.constant 41 : index
    %231 = memref.load %arg1[%c41] : memref<80xf32, #tpu.memory_space<smem>>
    %232 = vector.broadcast %231 : f32 to vector<1x128xf32>
    %233 = arith.subf %221, %232 : vector<1x128xf32>
    %234 = arith.mulf %233, %233 : vector<1x128xf32>
    %235 = arith.addf %197, %234 : vector<1x128xf32>
    %c73 = arith.constant 73 : index
    %236 = memref.load %arg1[%c73] : memref<80xf32, #tpu.memory_space<smem>>
    %237 = vector.broadcast %236 : f32 to vector<1x128xf32>
    %238 = arith.mulf %221, %237 : vector<1x128xf32>
    %239 = arith.addf %201, %238 : vector<1x128xf32>
    %c42 = arith.constant 42 : index
    %240 = memref.load %arg1[%c42] : memref<80xf32, #tpu.memory_space<smem>>
    %241 = vector.broadcast %240 : f32 to vector<1x128xf32>
    %242 = arith.subf %221, %241 : vector<1x128xf32>
    %243 = arith.mulf %242, %242 : vector<1x128xf32>
    %244 = arith.addf %206, %243 : vector<1x128xf32>
    %c74 = arith.constant 74 : index
    %245 = memref.load %arg1[%c74] : memref<80xf32, #tpu.memory_space<smem>>
    %246 = vector.broadcast %245 : f32 to vector<1x128xf32>
    %247 = arith.mulf %221, %246 : vector<1x128xf32>
    %248 = arith.addf %210, %247 : vector<1x128xf32>
    %c43 = arith.constant 43 : index
    %249 = memref.load %arg1[%c43] : memref<80xf32, #tpu.memory_space<smem>>
    %250 = vector.broadcast %249 : f32 to vector<1x128xf32>
    %251 = arith.subf %221, %250 : vector<1x128xf32>
    %252 = arith.mulf %251, %251 : vector<1x128xf32>
    %253 = arith.addf %215, %252 : vector<1x128xf32>
    %c75 = arith.constant 75 : index
    %254 = memref.load %arg1[%c75] : memref<80xf32, #tpu.memory_space<smem>>
    %255 = vector.broadcast %254 : f32 to vector<1x128xf32>
    %256 = arith.mulf %221, %255 : vector<1x128xf32>
    %257 = arith.addf %219, %256 : vector<1x128xf32>
    %c7 = arith.constant 7 : index
    %c0_14 = arith.constant 0 : index
    %c0_15 = arith.constant 0 : index
    %258 = vector.load %arg2[%c7, %c0_14, %c0_15] : memref<8x1x128xf32, #tpu.memory_space<vmem>>, vector<1x1x128xf32>
    %259 = vector.shape_cast %258 : vector<1x1x128xf32> to vector<1x128xf32>
    %c44 = arith.constant 44 : index
    %260 = memref.load %arg1[%c44] : memref<80xf32, #tpu.memory_space<smem>>
    %261 = vector.broadcast %260 : f32 to vector<1x128xf32>
    %262 = arith.subf %259, %261 : vector<1x128xf32>
    %263 = arith.mulf %262, %262 : vector<1x128xf32>
    %264 = arith.addf %226, %263 : vector<1x128xf32>
    %c76 = arith.constant 76 : index
    %265 = memref.load %arg1[%c76] : memref<80xf32, #tpu.memory_space<smem>>
    %266 = vector.broadcast %265 : f32 to vector<1x128xf32>
    %267 = arith.mulf %259, %266 : vector<1x128xf32>
    %268 = arith.addf %230, %267 : vector<1x128xf32>
    %c45 = arith.constant 45 : index
    %269 = memref.load %arg1[%c45] : memref<80xf32, #tpu.memory_space<smem>>
    %270 = vector.broadcast %269 : f32 to vector<1x128xf32>
    %271 = arith.subf %259, %270 : vector<1x128xf32>
    %272 = arith.mulf %271, %271 : vector<1x128xf32>
    %273 = arith.addf %235, %272 : vector<1x128xf32>
    %c77 = arith.constant 77 : index
    %274 = memref.load %arg1[%c77] : memref<80xf32, #tpu.memory_space<smem>>
    %275 = vector.broadcast %274 : f32 to vector<1x128xf32>
    %276 = arith.mulf %259, %275 : vector<1x128xf32>
    %277 = arith.addf %239, %276 : vector<1x128xf32>
    %c46 = arith.constant 46 : index
    %278 = memref.load %arg1[%c46] : memref<80xf32, #tpu.memory_space<smem>>
    %279 = vector.broadcast %278 : f32 to vector<1x128xf32>
    %280 = arith.subf %259, %279 : vector<1x128xf32>
    %281 = arith.mulf %280, %280 : vector<1x128xf32>
    %282 = arith.addf %244, %281 : vector<1x128xf32>
    %c78 = arith.constant 78 : index
    %283 = memref.load %arg1[%c78] : memref<80xf32, #tpu.memory_space<smem>>
    %284 = vector.broadcast %283 : f32 to vector<1x128xf32>
    %285 = arith.mulf %259, %284 : vector<1x128xf32>
    %286 = arith.addf %248, %285 : vector<1x128xf32>
    %c47 = arith.constant 47 : index
    %287 = memref.load %arg1[%c47] : memref<80xf32, #tpu.memory_space<smem>>
    %288 = vector.broadcast %287 : f32 to vector<1x128xf32>
    %289 = arith.subf %259, %288 : vector<1x128xf32>
    %290 = arith.mulf %289, %289 : vector<1x128xf32>
    %291 = arith.addf %253, %290 : vector<1x128xf32>
    %c79 = arith.constant 79 : index
    %292 = memref.load %arg1[%c79] : memref<80xf32, #tpu.memory_space<smem>>
    %293 = vector.broadcast %292 : f32 to vector<1x128xf32>
    %294 = arith.mulf %259, %293 : vector<1x128xf32>
    %295 = arith.addf %257, %294 : vector<1x128xf32>
    %c4_16 = arith.constant 4 : index
    %296 = memref.load %arg1[%c4_16] : memref<80xf32, #tpu.memory_space<smem>>
    %cst = arith.constant 0.000000e+00 : f32
    %297 = arith.subf %cst, %296 : f32
    %298 = vector.broadcast %297 : f32 to vector<1x128xf32>
    %299 = arith.mulf %298, %264 : vector<1x128xf32>
    %300 = math.exp %299 : vector<1x128xf32>
    %c0_17 = arith.constant 0 : index
    %301 = memref.load %arg1[%c0_17] : memref<80xf32, #tpu.memory_space<smem>>
    %302 = vector.broadcast %301 : f32 to vector<1x128xf32>
    %303 = arith.mulf %302, %300 : vector<1x128xf32>
    %c12 = arith.constant 12 : index
    %304 = memref.load %arg1[%c12] : memref<80xf32, #tpu.memory_space<smem>>
    %305 = vector.broadcast %304 : f32 to vector<1x128xf32>
    %306 = arith.addf %268, %305 : vector<1x128xf32>
    %307 = arith.mulf %306, %303 : vector<1x128xf32>
    %c8 = arith.constant 8 : index
    %308 = memref.load %arg1[%c8] : memref<80xf32, #tpu.memory_space<smem>>
    %309 = arith.mulf %303, %303 : vector<1x128xf32>
    %310 = vector.broadcast %308 : f32 to vector<1x128xf32>
    %311 = arith.mulf %310, %309 : vector<1x128xf32>
    %c5_18 = arith.constant 5 : index
    %312 = memref.load %arg1[%c5_18] : memref<80xf32, #tpu.memory_space<smem>>
    %cst_19 = arith.constant 0.000000e+00 : f32
    %313 = arith.subf %cst_19, %312 : f32
    %314 = vector.broadcast %313 : f32 to vector<1x128xf32>
    %315 = arith.mulf %314, %273 : vector<1x128xf32>
    %316 = math.exp %315 : vector<1x128xf32>
    %c1_20 = arith.constant 1 : index
    %317 = memref.load %arg1[%c1_20] : memref<80xf32, #tpu.memory_space<smem>>
    %318 = vector.broadcast %317 : f32 to vector<1x128xf32>
    %319 = arith.mulf %318, %316 : vector<1x128xf32>
    %c13 = arith.constant 13 : index
    %320 = memref.load %arg1[%c13] : memref<80xf32, #tpu.memory_space<smem>>
    %321 = vector.broadcast %320 : f32 to vector<1x128xf32>
    %322 = arith.addf %277, %321 : vector<1x128xf32>
    %323 = arith.mulf %322, %319 : vector<1x128xf32>
    %c9 = arith.constant 9 : index
    %324 = memref.load %arg1[%c9] : memref<80xf32, #tpu.memory_space<smem>>
    %325 = arith.mulf %319, %319 : vector<1x128xf32>
    %326 = vector.broadcast %324 : f32 to vector<1x128xf32>
    %327 = arith.mulf %326, %325 : vector<1x128xf32>
    %328 = arith.addf %303, %319 : vector<1x128xf32>
    %329 = arith.addf %307, %323 : vector<1x128xf32>
    %330 = arith.addf %311, %327 : vector<1x128xf32>
    %c6_21 = arith.constant 6 : index
    %331 = memref.load %arg1[%c6_21] : memref<80xf32, #tpu.memory_space<smem>>
    %cst_22 = arith.constant 0.000000e+00 : f32
    %332 = arith.subf %cst_22, %331 : f32
    %333 = vector.broadcast %332 : f32 to vector<1x128xf32>
    %334 = arith.mulf %333, %282 : vector<1x128xf32>
    %335 = math.exp %334 : vector<1x128xf32>
    %c2_23 = arith.constant 2 : index
    %336 = memref.load %arg1[%c2_23] : memref<80xf32, #tpu.memory_space<smem>>
    %337 = vector.broadcast %336 : f32 to vector<1x128xf32>
    %338 = arith.mulf %337, %335 : vector<1x128xf32>
    %c14 = arith.constant 14 : index
    %339 = memref.load %arg1[%c14] : memref<80xf32, #tpu.memory_space<smem>>
    %340 = vector.broadcast %339 : f32 to vector<1x128xf32>
    %341 = arith.addf %286, %340 : vector<1x128xf32>
    %342 = arith.mulf %341, %338 : vector<1x128xf32>
    %c10 = arith.constant 10 : index
    %343 = memref.load %arg1[%c10] : memref<80xf32, #tpu.memory_space<smem>>
    %344 = arith.mulf %338, %338 : vector<1x128xf32>
    %345 = vector.broadcast %343 : f32 to vector<1x128xf32>
    %346 = arith.mulf %345, %344 : vector<1x128xf32>
    %347 = arith.addf %328, %338 : vector<1x128xf32>
    %348 = arith.addf %329, %342 : vector<1x128xf32>
    %349 = arith.addf %330, %346 : vector<1x128xf32>
    %c7_24 = arith.constant 7 : index
    %350 = memref.load %arg1[%c7_24] : memref<80xf32, #tpu.memory_space<smem>>
    %cst_25 = arith.constant 0.000000e+00 : f32
    %351 = arith.subf %cst_25, %350 : f32
    %352 = vector.broadcast %351 : f32 to vector<1x128xf32>
    %353 = arith.mulf %352, %291 : vector<1x128xf32>
    %354 = math.exp %353 : vector<1x128xf32>
    %c3_26 = arith.constant 3 : index
    %355 = memref.load %arg1[%c3_26] : memref<80xf32, #tpu.memory_space<smem>>
    %356 = vector.broadcast %355 : f32 to vector<1x128xf32>
    %357 = arith.mulf %356, %354 : vector<1x128xf32>
    %c15 = arith.constant 15 : index
    %358 = memref.load %arg1[%c15] : memref<80xf32, #tpu.memory_space<smem>>
    %359 = vector.broadcast %358 : f32 to vector<1x128xf32>
    %360 = arith.addf %295, %359 : vector<1x128xf32>
    %361 = arith.mulf %360, %357 : vector<1x128xf32>
    %c11 = arith.constant 11 : index
    %362 = memref.load %arg1[%c11] : memref<80xf32, #tpu.memory_space<smem>>
    %363 = arith.mulf %357, %357 : vector<1x128xf32>
    %364 = vector.broadcast %362 : f32 to vector<1x128xf32>
    %365 = arith.mulf %364, %363 : vector<1x128xf32>
    %366 = arith.addf %347, %357 : vector<1x128xf32>
    %367 = arith.addf %348, %361 : vector<1x128xf32>
    %368 = arith.addf %349, %365 : vector<1x128xf32>
    %cst_27 = arith.constant 9.99999993E-9 : f32
    %369 = vector.broadcast %cst_27 : f32 to vector<1x128xf32>
    %370 = arith.maximumf %366, %369 : vector<1x128xf32>
    %371 = tpu.reciprocal %370 {approx = true} : vector<1x128xf32> -> vector<1x128xf32>
    %372 = arith.mulf %370, %371 : vector<1x128xf32>
    %cst_28 = arith.constant 2.000000e+00 : f32
    %373 = vector.broadcast %cst_28 : f32 to vector<1x128xf32>
    %374 = arith.subf %373, %372 : vector<1x128xf32>
    %375 = arith.mulf %371, %374 : vector<1x128xf32>
    %376 = arith.mulf %367, %375 : vector<1x128xf32>
    %c0_29 = arith.constant 0 : index
    %c0_30 = arith.constant 0 : index
    %c0_31 = arith.constant 0 : index
    %377 = vector.load %arg3[%c0_29, %c0_30, %c0_31] : memref<3x1x128xf32, #tpu.memory_space<vmem>>, vector<1x1x128xf32>
    %378 = vector.shape_cast %377 : vector<1x1x128xf32> to vector<1x128xf32>
    %379 = vector.shape_cast %376 : vector<1x128xf32> to vector<1x1x128xf32>
    tpu.vector_store %arg3[%c0_29, %c0_30, %c0_31], %379 {strides = array<i32>} : memref<3x1x128xf32, #tpu.memory_space<vmem>>, vector<1x1x128xf32>,
    %380 = arith.mulf %375, %375 : vector<1x128xf32>
    %381 = arith.mulf %368, %380 : vector<1x128xf32>
    %c1_32 = arith.constant 1 : index
    %c0_33 = arith.constant 0 : index
    %c0_34 = arith.constant 0 : index
    %382 = vector.load %arg3[%c1_32, %c0_33, %c0_34] : memref<3x1x128xf32, #tpu.memory_space<vmem>>, vector<1x1x128xf32>
    %383 = vector.shape_cast %382 : vector<1x1x128xf32> to vector<1x128xf32>
    %384 = vector.shape_cast %381 : vector<1x128xf32> to vector<1x1x128xf32>
    tpu.vector_store %arg3[%c1_32, %c0_33, %c0_34], %384 {strides = array<i32>} : memref<3x1x128xf32, #tpu.memory_space<vmem>>, vector<1x1x128xf32>,
    %c2_35 = arith.constant 2 : index
    %c0_36 = arith.constant 0 : index
    %c0_37 = arith.constant 0 : index
    %385 = vector.load %arg3[%c2_35, %c0_36, %c0_37] : memref<3x1x128xf32, #tpu.memory_space<vmem>>, vector<1x1x128xf32>
    %386 = vector.shape_cast %385 : vector<1x1x128xf32> to vector<1x128xf32>
    %387 = vector.shape_cast %370 : vector<1x128xf32> to vector<1x1x128xf32>
    tpu.vector_store %arg3[%c2_35, %c0_36, %c0_37], %387 {strides = array<i32>} : memref<3x1x128xf32, #tpu.memory_space<vmem>>, vector<1x1x128xf32>,
    return
  }
  func.func @transform_0(%arg0: i32) -> i32 {
    %c0_i32 = arith.constant 0 : i32
    %c0_i32_0 = arith.constant 0 : i32
    return %c0_i32 : i32
  }
  func.func @transform_1(%arg0: i32) -> (i32, i32, i32) {
    %c0_i32 = arith.constant 0 : i32
    %c0_i32_0 = arith.constant 0 : i32
    %c0_i32_1 = arith.constant 0 : i32
    return %c0_i32, %arg0, %c0_i32_0 : i32, i32, i32
  }
  func.func @transform_2(%arg0: i32) -> (i32, i32, i32) {
    %c0_i32 = arith.constant 0 : i32
    %c0_i32_0 = arith.constant 0 : i32
    %c0_i32_1 = arith.constant 0 : i32
    return %c0_i32, %arg0, %c0_i32_0 : i32, i32, i32
  }
}

</mosaic_0001>

<bundles_post_ra>
// kernel: mul.2
= control target key start
LH: loop header
LB: loop body
LE: loop exit
PB: predicated region body
PF: predicated region fallthrough
CT: control target
= control target key end

     0   :  { %s34_s0 = inlined_call_operand.vmem [shape: f32[1,4], index: 0, kind: input, shape index: {}, may-alias: {0,1}]   ;;  %s35_s1 = inlined_call_operand.vmem [shape: f32[1,4], index: 1, kind: input, shape index: {}, may-alias: {0,1}]   ;;  %s36_s2 = inlined_call_operand.vmem [shape: f32[1,4], index: 2, kind: output, shape index: {}]  }
   0x1   :  { %v3_v0 = vld [vmem:[%s34_s0] sm:$0xf] }
   0x2   :  { %v4_v1 = vld [vmem:[%s35_s1] sm:$0xf] }
   0x3   :  { %v7_v2 = vmul.f32 %v4_v1, %v3_v0 }
   0x5   :  { %9 = vst [vmem:[%s36_s2] sm:$0xf] %v7_v2 }

// kernel: evreg_forward.1
= control target key start
LH: loop header
LB: loop body
LE: loop exit
PB: predicated region body
PF: predicated region fallthrough
CT: control target
= control target key end

     0   :  { %7 = vsyncpa [#allocation3], 0  ;;  %s886_s0 = inlined_call_operand.vmem [shape: f32[80], index: 0, kind: input, shape index: {}]   ;;  %s887_s1 = inlined_call_operand.vmem [shape: f32[8,1,128], index: 1, kind: input, shape index: {}]   ;;  %s888_s2 = inlined_call_operand.vmem [shape: f32[3,1,128], index: 2, kind: output, shape index: {}]  }
   0x1   :  { %s14_s11 = sshll.u32 %s886_s0, 4  ;;  %s15_s11 = int_to_ptr.vmem [resolvable:$true] %s14_s11 }
   0x2   :  { %s513_s12 = scalar_lea.vmem %s15_s11, 16  ;;  %p518_p1 = scmp.lt.s32.totalorder %s15_s11, %s15_s11 }
   0x3   :  { %p514_p0 = scmp.ne.s32.totalorder %s15_s11, %s513_s12  ;;  %p519_p2 = scmp.lt.s32.totalorder %s513_s12, %s513_s12 }
   0x5   :  { %p520_p3 = por %p519_p2, %p518_p1 }
   0x7   :  { %p521_p4 = pnand %p520_p3, %p514_p0 }
   0x9   :  { %524 = shalt.err (!%p521_p4)
}
   0xa   :  { %s527_s13 = smov [#allocation2]  }
   0xb   :  { %17 = dma.vmem_to_smem %s15_s11, 16, %s527_s13, [#allocation3]  }
   0xc   :  { %525 = dma.done.wait [#allocation3], 16  }
   0xd   :  { %526 = vsyncadd [#allocation3], 4294967280 }
   0xe   :  { %23 = sfence }
   0xf   :  { %s414_s14 = sld [smem:[#allocation2 + $0x10]]  ;;  %s416_s15 = sld [smem:[#allocation2 + $0x11]]  ;;  %v24_v0 = vld [vmem:[%s887_s1] sm:$0x1]  ;;  %v579_v8 = vld [vmem:[%s887_s1 + $0x1] sm:$0x1] }
  0x10   :  { %s415_s16 = sld [smem:[#allocation2 + $0x30]]  ;;  %s418_s17 = sld [smem:[#allocation2 + $0x12]]  ;;  %v605_v26 = vld [vmem:[%s887_s1 + $0x2] sm:$0x1]  ;;  %v630_v43 = vld [vmem:[%s887_s1 + $0x3] sm:$0x1] }
  0x11   :  { %s546_s18 = sld [smem:[#allocation2 + $0x31]]  ;;  %s548_s0 = sld [smem:[#allocation2 + $0x14]] }
  0x12   :  { %s550_s19 = sld [smem:[#allocation2 + $0x32]]  ;;  %s552_s20 = sld [smem:[#allocation2 + $0x15]] }
  0x13   :  { %s554_s21 = sld [smem:[#allocation2 + $0x16]]  ;;  %s556_s22 = sld [smem:[#allocation2 + $0x13]] }
  0x14   :  { %s558_s23 = sld [smem:[#allocation2 + $0x34]]  ;;  %s560_s24 = sld [smem:[#allocation2 + $0x17]] }
  0x15   :  { %v26_v1 = vstv %s414_s14  ;;  %v33_v2 = vstv %s416_s15  ;;  %s565_s27 = sld [smem:[#allocation2 + $0x35]]  ;;  %s567_s28 = sld [smem:[#allocation2 + $0x18]] }
  0x16   :  { %s569_s29 = sld [smem:[#allocation2 + $0x33]]  ;;  %v30_v3 = vstv %s415_s16  ;;  %v40_v4 = vstv %s418_s17  ;;  %s571_s30 = sld [smem:[#allocation2 + $0x19]]  ;;  %v27_v5 = vsub.f32 %v24_v0, %v26_v1  ;;  %v34_v6 = vsub.f32 %v24_v0, %v33_v2 }
  0x17   :  { %s573_s3 = sld [smem:[#allocation2 + $0x1a]]  ;;  %v37_v7 = vstv %s546_s18  ;;  %v56_v9 = vstv %s548_s0  ;;  %s582_s6 = sld [smem:[#allocation2 + $0x36]]  ;;  %v31_v11 = vmul.f32 %v30_v3, %v24_v0  ;;  %v41_v12 = vsub.f32 %v24_v0, %v40_v4 }
  0x18   :  { %s584_s7 = sld [smem:[#allocation2 + $0x1b]]  ;;  %v44_v10 = vstv %s550_s19  ;;  %s587_s8 = sld [smem:[#allocation2 + $0x1c]]  ;;  %v65_v13 = vstv %s552_s20  ;;  %v38_v15 = vmul.f32 %v37_v7, %v24_v0  ;;  %v57_v17 = vsub.f32 %v579_v8, %v56_v9 }
  0x19   :  { %v74_v14 = vstv %s554_s21  ;;  %v47_v16 = vstv %s556_s22  ;;  %v28_v19 = vmul.f32 %v27_v5, %v27_v5  ;;  %v35_v20 = vmul.f32 %v34_v6, %v34_v6  ;;  %s595_s9 = sld [smem:[#allocation2 + $0x1d]]  ;;  %s600_s10 = sld [smem:[#allocation2 + $0x37]] }
  0x1a   :  { %v61_v18 = vstv %s558_s23  ;;  %v45_v21 = vmul.f32 %v44_v10, %v24_v0  ;;  %v83_v22 = vstv %s560_s24  ;;  %v66_v23 = vsub.f32 %v579_v8, %v65_v13  ;;  %s608_s13 = sld [smem:[#allocation2 + $0x1e]]  ;;  %s612_s14 = sld [smem:[#allocation2 + $0x1f]] }
  0x1b   :  { %v70_v24 = vstv %s565_s27  ;;  %v75_v25 = vsub.f32 %v579_v8, %v74_v14  ;;  %v94_v27 = vstv %s567_s28  ;;  %v42_v28 = vmul.f32 %v41_v12, %v41_v12  ;;  %s614_s15 = sld [smem:[#allocation2 + $0x20]]  ;;  %s623_s16 = sld [smem:[#allocation2 + $0x21]] }
  0x1c   :  { %v48_v29 = vsub.f32 %v24_v0, %v47_v16  ;;  %v51_v30 = vstv %s569_s29  ;;  %v62_v31 = vmul.f32 %v579_v8, %v61_v18  ;;  %v58_v32 = vmul.f32 %v57_v17, %v57_v17  ;;  %s633_s0 = sld [smem:[#allocation2 + $0x22]]  ;;  %s637_s19 = sld [smem:[#allocation2 + $0x38]]  ;;  %v685_v18 = vld [vmem:[%s887_s1 + $0x5] sm:$0x1] }
  0x1d   :  { %v84_v33 = vsub.f32 %v579_v8, %v83_v22  ;;  %v103_v34 = vstv %s571_s30  ;;  %v112_v35 = vstv %s573_s3  ;;  %v71_v36 = vmul.f32 %v579_v8, %v70_v24  ;;  %s641_s20 = sld [smem:[#allocation2 + $0x24]]  ;;  %s645_s21 = sld [smem:[#allocation2 + $0x23]] }
  0x1e   :  { %v79_v37 = vstv %s582_s6  ;;  %v95_v38 = vsub.f32 %v605_v26, %v94_v27  ;;  %v121_v39 = vstv %s584_s7  ;;  %v625_v40 = vmul.f32 %v51_v30, %v24_v0  ;;  %s651_s22 = sld [smem:[#allocation2 + $0x25]]  ;;  %s655_s23 = sld [smem:[#allocation2 + $0x26]]  ;;  %v663_v0 = vld [vmem:[%s887_s1 + $0x4] sm:$0x1] }
  0x1f   :  { %v67_v41 = vmul.f32 %v66_v23, %v66_v23  ;;  %v76_v42 = vmul.f32 %v75_v25, %v75_v25  ;;  %v132_v44 = vstv %s587_s8  ;;  %v49_v45 = vmul.f32 %v48_v29, %v48_v29  ;;  %s657_s24 = sld [smem:[#allocation2 + $0x39]]  ;;  %s669_s27 = sld [smem:[#allocation2 + $0x27]] }
  0x20   :  { %v635_v46 = vadd.f32 %v62_v31, %v31_v11  ;;  %v104_v47 = vsub.f32 %v605_v26, %v103_v34  ;;  %v113_v48 = vsub.f32 %v605_v26, %v112_v35  ;;  %v59_v49 = vadd.f32 %v58_v32, %v28_v19  ;;  %s673_s28 = sld [smem:[#allocation2 + $0x28]]  ;;  %s676_s29 = sld [smem:[#allocation2 + $0x3a]] }
  0x21   :  { %v80_v50 = vmul.f32 %v579_v8, %v79_v37  ;;  %v85_v51 = vmul.f32 %v84_v33, %v84_v33  ;;  %v122_v52 = vsub.f32 %v605_v26, %v121_v39  ;;  %v647_v53 = vadd.f32 %v71_v36, %v38_v15  ;;  %s688_s4 = sld [smem:[#allocation2 + $0x29]]  ;;  %s694_s5 = sld [smem:[#allocation2 + $0x2a]] }
  0x22   :  { %v96_v54 = vmul.f32 %v95_v38, %v95_v38  ;;  %v133_v55 = vsub.f32 %v630_v43, %v132_v44  ;;  %v141_v56 = vstv %s595_s9  ;;  %v68_v57 = vadd.f32 %v67_v41, %v35_v20  ;;  %s703_s6 = sld [smem:[#allocation2 + $0x3b]]  ;;  %s719_s11 = sld [smem:[#allocation2 + $0x2c]] }
  0x23   :  { %v77_v58 = vadd.f32 %v76_v42, %v42_v28  ;;  %v88_v59 = vstv %s600_s10  ;;  %v150_v60 = vstv %s608_s13  ;;  %v105_v61 = vmul.f32 %v104_v47, %v104_v47  ;;  %s706_s7 = sld [smem:[#allocation2 + $0x2b]]  ;;  %s715_s10 = sld [smem:[#allocation2 + $0x3c]] }
  0x24   :  { %v114_v62 = vmul.f32 %v113_v48, %v113_v48  ;;  %v159_v63 = vstv %s612_s14  ;;  %v170_v1 = vstv %s614_s15  ;;  %v666_v2 = vadd.f32 %v80_v50, %v45_v21  ;;  %s722_s12 = sld [smem:[#allocation2 + $0x3d]]  ;;  %s729_s14 = sld [smem:[#allocation2 + $0x2e]] }
  0x25   :  { %v86_v3 = vadd.f32 %v85_v51, %v49_v45  ;;  %v123_v4 = vmul.f32 %v122_v52, %v122_v52  ;;  %v142_v5 = vsub.f32 %v630_v43, %v141_v56  ;;  %v97_v6 = vadd.f32 %v96_v54, %v59_v49  ;;  %s724_s13 = sld [smem:[#allocation2 + $0x2d]]  ;;  %s731_s15 = sld [smem:[#allocation2 + $0x4]] }
  0x26   :  { %v134_v7 = vmul.f32 %v133_v55, %v133_v55  ;;  %v151_v9 = vsub.f32 %v630_v43, %v150_v60  ;;  %v179_v10 = vstv %s623_s16  ;;  %v89_v11 = vmul.f32 %v579_v8, %v88_v59  ;;  %s739_s16 = sld [smem:[#allocation2 + $0x2f]]  ;;  %s742_s17 = sld [smem:[#allocation2 + $0x3e]] }
  0x27   :  { %v160_v12 = vsub.f32 %v630_v43, %v159_v63  ;;  %v171_v13 = vsub.f32 %v663_v0, %v170_v1  ;;  %v188_v14 = vstv %s633_s0  ;;  %v99_v15 = vstv %s637_s19  ;;  %s752_s19 = sld [smem:[#allocation2 + $0x5]]  ;;  %s777_s25 = sld [smem:[#allocation2 + $0x42]] }
  0x28   :  { %v106_v16 = vadd.f32 %v105_v61, %v68_v57  ;;  %v115_v17 = vadd.f32 %v114_v62, %v77_v58  ;;  %v208_v19 = vstv %s641_s20  ;;  %v124_v8 = vadd.f32 %v123_v4, %v86_v3  ;;  %s756_s20 = sld [smem:[#allocation2 + $0x6]]  ;;  %s782_s26 = sld [smem:[#allocation2 + $0x44]] }
  0x29   :  { %v143_v20 = vmul.f32 %v142_v5, %v142_v5  ;;  %v180_v21 = vsub.f32 %v663_v0, %v179_v10  ;;  %v197_v22 = vstv %s645_s21  ;;  %v135_v23 = vadd.f32 %v134_v7, %v97_v6  ;;  %v750_v10 = vld [vmem:[%s887_s1 + $0x7] sm:$0x1]  ;;  %s759_s21 = sld [smem:[#allocation2 + $0x40]]  ;;  %s794_s3 = sld [smem:[#allocation2 + $0x46]] }
  0x2a   :  { %v152_v24 = vmul.f32 %v151_v9, %v151_v9  ;;  %v189_v25 = vsub.f32 %v663_v0, %v188_v14  ;;  %v217_v27 = vstv %s651_s22  ;;  %v161_v28 = vmul.f32 %v160_v12, %v160_v12  ;;  %s767_s22 = sld [smem:[#allocation2 + $0x41]]  ;;  %s811_s8 = sld [smem:[#allocation2 + $0x4a]] }
  0x2b   :  { %v172_v29 = vmul.f32 %v171_v13, %v171_v13  ;;  %v209_v30 = vsub.f32 %v685_v18, %v208_v19  ;;  %v226_v31 = vstv %s655_s23  ;;  %v699_v32 = vadd.f32 %v89_v11, %v625_v40  ;;  %v713_v40 = vld [vmem:[%s887_s1 + $0x6] sm:$0x1]  ;;  %s765_s1 = sld [smem:[#allocation2 + $0x7]]  ;;  %s320_s23 = ssub.f32 0.0, %s731_s15 }
  0x2c   :  { %v100_v33 = vmul.f32 %v605_v26, %v99_v15  ;;  %v108_v34 = vstv %s657_s24  ;;  %v198_v35 = vsub.f32 %v663_v0, %v197_v22  ;;  %v144_v36 = vadd.f32 %v143_v20, %v106_v16  ;;  %s773_s24 = sld [smem:[#allocation2 + $0x3f]]  ;;  %s813_s9 = sld [smem:[#allocation2]] }
  0x2d   :  { %v181_v37 = vmul.f32 %v180_v21, %v180_v21  ;;  %v218_v38 = vsub.f32 %v685_v18, %v217_v27  ;;  %v235_v39 = vstv %s669_s27  ;;  %v153_v41 = vadd.f32 %v152_v24, %v115_v17  ;;  %s785_s27 = sld [smem:[#allocation2 + $0x45]]  ;;  %s834_s15 = sld [smem:[#allocation2 + $0x4e]] }
  0x2e   :  { %v190_v42 = vmul.f32 %v189_v25, %v189_v25  ;;  %v227_v44 = vsub.f32 %v685_v18, %v226_v31  ;;  %v246_v45 = vstv %s673_s28  ;;  %v117_v47 = vstv %s676_s29  ;;  %s337_s28 = ssub.f32 0.0, %s752_s19  ;;  %s789_s29 = sld [smem:[#allocation2 + $0x43]] }
  0x2f   :  { %v162_v48 = vadd.f32 %v161_v28, %v124_v8  ;;  %v173_v49 = vadd.f32 %v172_v29, %v135_v23  ;;  %v210_v50 = vmul.f32 %v209_v30, %v209_v30  ;;  %v199_v51 = vmul.f32 %v198_v35, %v198_v35  ;;  %s357_s30 = ssub.f32 0.0, %s756_s20  ;;  %s849_s18 = sld [smem:[#allocation2 + $0xc]] }
  0x30   :  { %v236_v52 = vsub.f32 %v685_v18, %v235_v39  ;;  %v247_v54 = vsub.f32 %v713_v40, %v246_v45  ;;  %v255_v55 = vstv %s688_s4  ;;  %v109_v56 = vmul.f32 %v605_v26, %v108_v34  ;;  %s798_s4 = sld [smem:[#allocation2 + $0x48]]  ;;  %s851_s0 = sld [smem:[#allocation2 + $0xd]] }
  0x31   :  { %v182_v57 = vadd.f32 %v181_v37, %v144_v36  ;;  %v219_v58 = vmul.f32 %v218_v38, %v218_v38  ;;  %v256_v59 = vsub.f32 %v713_v40, %v255_v55  ;;  %v736_v60 = vadd.f32 %v100_v33, %v635_v46  ;;  %s861_s19 = sld [smem:[#allocation2 + $0xe]]  ;;  %s865_s20 = sld [smem:[#allocation2 + $0x8]] }
  0x32   :  { %v191_v61 = vadd.f32 %v190_v42, %v153_v41  ;;  %v228_v62 = vmul.f32 %v227_v44, %v227_v44  ;;  %v264_v63 = vstv %s694_s5  ;;  %v118_v1 = vmul.f32 %v605_v26, %v117_v47  ;;  %s377_s5 = ssub.f32 0.0, %s765_s1  ;;  %s498_s1 = sld [smem:[#allocation2 + $0xf]] }
  0x33   :  { %v211_v3 = vadd.f32 %v210_v50, %v173_v49  ;;  %v248_v4 = vmul.f32 %v247_v54, %v247_v54  ;;  %v265_v5 = vsub.f32 %v713_v40, %v264_v63  ;;  %v126_v6 = vstv %s703_s6  ;;  %s802_s6 = sld [smem:[#allocation2 + $0x49]] }
  0x34   :  { %v200_v7 = vadd.f32 %v199_v51, %v162_v48  ;;  %v237_v46 = vmul.f32 %v236_v52, %v236_v52  ;;  %v273_v9 = vstv %s706_s7  ;;  %v110_v11 = vadd.f32 %v109_v56, %v647_v53  ;;  %s807_s7 = sld [smem:[#allocation2 + $0x47]] }
  0x35   :  { %v220_v12 = vadd.f32 %v219_v58, %v182_v57  ;;  %v257_v13 = vmul.f32 %v256_v59, %v256_v59  ;;  %v274_v14 = vsub.f32 %v713_v40, %v273_v9  ;;  %v137_v15 = vstv %s715_s10  ;;  %s817_s10 = sld [smem:[#allocation2 + $0x4c]] }
  0x36   :  { %v229_v16 = vadd.f32 %v228_v62, %v191_v61  ;;  %v266_v17 = vmul.f32 %v265_v5, %v265_v5  ;;  %v284_v19 = vstv %s719_s11  ;;  %v127_v8 = vmul.f32 %v605_v26, %v126_v6  ;;  %s819_s11 = sld [smem:[#allocation2 + $0x4d]] }
  0x37   :  { %v146_v20 = vstv %s722_s12  ;;  %v249_v21 = vadd.f32 %v248_v4, %v211_v3  ;;  %v285_v53 = vsub.f32 %v750_v10, %v284_v19  ;;  %v238_v22 = vadd.f32 %v237_v46, %v200_v7  ;;  %s823_s12 = sld [smem:[#allocation2 + $0x1]] }
  0x38   :  { %v275_v23 = vmul.f32 %v274_v14, %v274_v14  ;;  %v293_v24 = vstv %s724_s13  ;;  %v302_v25 = vstv %s729_s14  ;;  %v138_v27 = vmul.f32 %v630_v43, %v137_v15  ;;  %s827_s13 = sld [smem:[#allocation2 + $0x2]]  ;;  %s831_s14 = sld [smem:[#allocation2 + $0x4b]] }
  0x39   :  { %v258_v26 = vadd.f32 %v257_v13, %v220_v12  ;;  %v286_v28 = vmul.f32 %v285_v53, %v285_v53  ;;  %v294_v29 = vsub.f32 %v750_v10, %v293_v24  ;;  %v147_v30 = vmul.f32 %v630_v43, %v146_v20 }
  0x3a   :  { %v267_v31 = vadd.f32 %v266_v17, %v229_v16  ;;  %v303_v33 = vsub.f32 %v750_v10, %v302_v25  ;;  %v311_v34 = vstv %s739_s16  ;;  %v155_v35 = vstv %s742_s17  ;;  %s836_s16 = sld [smem:[#allocation2 + $0x3]]  ;;  %s844_s17 = sld [smem:[#allocation2 + $0x4f]] }
  0x3b   :  { %v287_v36 = vadd.f32 %v286_v28, %v249_v21  ;;  %v295_v37 = vmul.f32 %v294_v29, %v294_v29  ;;  %v312_v38 = vsub.f32 %v750_v10, %v311_v34  ;;  %v276_v39 = vadd.f32 %v275_v23, %v238_v22 }
  0x3c   :  { %v304_v41 = vmul.f32 %v303_v33, %v303_v33  ;;  %v321_v42 = vstv %s320_s23  ;;  %v119_v44 = vadd.f32 %v118_v1, %v666_v2  ;;  %v156_v48 = vmul.f32 %v630_v43, %v155_v35  ;;  %s499_s23 = sld [smem:[#allocation2 + $0xb]] }
  0x3d   :  { %v296_v45 = vadd.f32 %v295_v37, %v258_v26  ;;  %v313_v47 = vmul.f32 %v312_v38, %v312_v38  ;;  %v175_v49 = vstv %s759_s21  ;;  %v322_v51 = vmul.f32 %v321_v42, %v287_v36  ;;  %s867_s21 = sld [smem:[#allocation2 + $0x9]] }
  0x3e   :  { %v305_v50 = vadd.f32 %v304_v41, %v267_v31  ;;  %v128_v52 = vadd.f32 %v127_v8, %v699_v32  ;;  %v139_v54 = vadd.f32 %v138_v27, %v736_v60  ;;  %v148_v55 = vadd.f32 %v147_v30, %v110_v11 }
  0x3f   :  { %v184_v2 = vstv %s767_s22  ;;  %v314_v56 = vadd.f32 %v313_v47, %v276_v39  ;;  %v323_v57 = vmul.f32 1.442695, %v322_v51  ;;  %v338_v58 = vstv %s337_s28  ;;  %s495_s22 = sld [smem:[#allocation2 + $0xa]] }
  0x40   :  { %v164_v59 = vstv %s773_s24  ;;  %v176_v61 = vmul.f32 %v663_v0, %v175_v49  ;;  %v339_v62 = vmul.f32 %v338_v58, %v296_v45  ;;  %v358_v63 = vstv %s357_s30 }
  0x41   :  { %v157_v32 = vadd.f32 %v156_v48, %v119_v44  ;;  %v193_v1 = vstv %s777_s25  ;;  %503 = vpow2.f32 %v323_v57  ;;  %v359_v60 = vmul.f32 %v358_v63, %v305_v50 }
  0x42   :  { %v185_v3 = vmul.f32 %v663_v0, %v184_v2  ;;  %v213_v4 = vstv %s782_s26  ;;  %v340_v5 = vmul.f32 1.442695, %v339_v62  ;;  %v378_v6 = vstv %s377_s5 }
  0x43   :  { %v165_v7 = vmul.f32 %v630_v43, %v164_v59  ;;  %v222_v46 = vstv %s785_s27  ;;  %v360_v9 = vmul.f32 1.442695, %v359_v60  ;;  %v379_v11 = vmul.f32 %v378_v6, %v314_v56 }
  0x44   :  { %v177_v12 = vadd.f32 %v176_v61, %v139_v54  ;;  %v194_v13 = vmul.f32 %v663_v0, %v193_v1  ;;  %v202_v14 = vstv %s789_s29  ;;  %505 = vpow2.f32 %v340_v5 }
  0x45   :  { %v214_v15 = vmul.f32 %v685_v18, %v213_v4  ;;  %v231_v16 = vstv %s794_s3  ;;  %507 = vpow2.f32 %v360_v9  ;;  %v380_v43 = vmul.f32 1.442695, %v379_v11 }
  0x46   :  { %v186_v17 = vadd.f32 %v185_v3, %v148_v55  ;;  %v223_v19 = vmul.f32 %v685_v18, %v222_v46  ;;  %v251_v8 = vstv %s798_s4  ;;  %v260_v20 = vstv %s802_s6 }
  0x47   :  { %509 = vpow2.f32 %v380_v43  ;;  %v166_v21 = vadd.f32 %v165_v7, %v128_v52  ;;  %v195_v53 = vadd.f32 %v194_v13, %v157_v32  ;;  %v203_v22 = vmul.f32 %v663_v0, %v202_v14 }
  0x48   :  { %v232_v23 = vmul.f32 %v685_v18, %v231_v16  ;;  %v215_v24 = vadd.f32 %v214_v15, %v177_v12  ;;  %v240_v25 = vstv %s807_s7  ;;  %v252_v27 = vmul.f32 %v713_v40, %v251_v8 }
  0x49   :  { %v224_v26 = vadd.f32 %v223_v19, %v186_v17  ;;  %v261_v28 = vmul.f32 %v713_v40, %v260_v20  ;;  %v269_v29 = vstv %s811_s8  ;;  %v326_v30 = vstv %s813_s9 }
  0x4a   :  { %v289_v33 = vstv %s817_s10  ;;  %v298_v34 = vstv %s819_s11  ;;  %v204_v0 = vadd.f32 %v203_v22, %v166_v21  ;;  %v233_v35 = vadd.f32 %v232_v23, %v195_v53 }
  0x4b   :  { %v504_v31 = vpop.eup %503  ;;  %v241_v36 = vmul.f32 %v685_v18, %v240_v25  ;;  %v343_v37 = vstv %s823_s12  ;;  %v253_v38 = vadd.f32 %v252_v27, %v215_v24  ;;  %v270_v39 = vmul.f32 %v713_v40, %v269_v29 }
  0x4c   :  { %v327_v41 = vmul.f32 %v504_v31, %v326_v30  ;;  %v363_v42 = vstv %s827_s13  ;;  %v262_v45 = vadd.f32 %v261_v28, %v224_v26  ;;  %v278_v47 = vstv %s831_s14 }
  0x4d   :  { %v290_v48 = vmul.f32 %v750_v10, %v289_v33  ;;  %v299_v49 = vmul.f32 %v750_v10, %v298_v34  ;;  %v307_v51 = vstv %s834_s15  ;;  %v383_v18 = vstv %s836_s16 }
  0x4e   :  { %v506_v44 = vpop.eup %505  ;;  %v242_v2 = vadd.f32 %v241_v36, %v204_v0  ;;  %v271_v56 = vadd.f32 %v270_v39, %v233_v35  ;;  %v279_v57 = vmul.f32 %v713_v40, %v278_v47  ;;  %v308_v62 = vmul.f32 %v750_v10, %v307_v51 }
  0x4f   :  { %v508_v50 = vpop.eup %507  ;;  %v344_v52 = vmul.f32 %v506_v44, %v343_v37  ;;  %v291_v59 = vadd.f32 %v290_v48, %v253_v38  ;;  %v300_v61 = vadd.f32 %v299_v49, %v262_v45  ;;  %v316_v32 = vstv %s844_s17 }
  0x50   :  { %v364_v54 = vmul.f32 %v508_v50, %v363_v42  ;;  %v329_v1 = vstv %s849_s18  ;;  %v346_v60 = vstv %s851_s0  ;;  %v280_v4 = vadd.f32 %v279_v57, %v242_v2 }
  0x51   :  { %v510_v55 = vpop.eup %509  ;;  %v353_v58 = vadd.f32 %v344_v52, %v327_v41  ;;  %v309_v5 = vadd.f32 %v308_v62, %v271_v56  ;;  %v317_v6 = vmul.f32 %v750_v10, %v316_v32  ;;  %v330_v7 = vadd.f32 %v329_v1, %v291_v59 }
  0x52   :  { %v384_v63 = vmul.f32 %v510_v55, %v383_v18  ;;  %v347_v46 = vadd.f32 %v346_v60, %v300_v61  ;;  %v366_v9 = vstv %s861_s19  ;;  %v333_v12 = vmul.f32 %v327_v41, %v327_v41 }
  0x53   :  { %v373_v3 = vadd.f32 %v364_v54, %v353_v58  ;;  %v350_v13 = vmul.f32 %v344_v52, %v344_v52  ;;  %v334_v14 = vstv %s865_s20  ;;  %v351_v15 = vstv %s867_s21 }
  0x54   :  { %v318_v16 = vadd.f32 %v317_v6, %v280_v4  ;;  %v331_v43 = vmul.f32 %v330_v7, %v327_v41  ;;  %v348_v17 = vmul.f32 %v347_v46, %v344_v52  ;;  %v367_v19 = vadd.f32 %v366_v9, %v309_v5 }
  0x55   :  { %v393_v40 = vadd.f32 %v384_v63, %v373_v3  ;;  %v386_v8 = vstv %s498_s1  ;;  %v335_v10 = vmul.f32 %v334_v14, %v333_v12  ;;  %v352_v20 = vmul.f32 %v351_v15, %v350_v13 }
  0x56   :  { %v370_v21 = vmul.f32 %v364_v54, %v364_v54  ;;  %v371_v53 = vstv %s495_s22  ;;  %v354_v22 = vadd.f32 %v348_v17, %v331_v43  ;;  %v368_v23 = vmul.f32 %v367_v19, %v364_v54 }
  0x57   :  { %v396_v11 = vmax.f32 %v393_v40, 1e-08  ;;  %v387_v24 = vadd.f32 %v386_v8, %v318_v16  ;;  %v355_v25 = vadd.f32 %v352_v20, %v335_v10  ;;  %v390_v26 = vmul.f32 %v384_v63, %v384_v63 }
  0x58   :  { %v372_v27 = vmul.f32 %v371_v53, %v370_v21  ;;  %v391_v28 = vstv %s499_s23  ;;  %v374_v29 = vadd.f32 %v368_v23, %v354_v22 }
  0x59   :  { %511 = vrcp.f32 %v396_v11  ;;  %501 = vst [vmem:[%s888_s2 + $0x2] sm:$0x1] %v396_v11  ;;  %v388_v30 = vmul.f32 %v387_v24, %v384_v63  ;;  %v392_v34 = vmul.f32 %v391_v28, %v390_v26 }
  0x5a   :  { %v375_v33 = vadd.f32 %v372_v27, %v355_v25 }
  0x5b   :  { %v394_v35 = vadd.f32 %v388_v30, %v374_v29 }
  0x5c   :  { %v395_v37 = vadd.f32 %v392_v34, %v375_v33 }
  0x63   :  { %v512_v31 = vpop.eup %511 }
  0x64   :  { %v398_v0 = vmul.f32 %v512_v31, %v396_v11 }
  0x66   :  { %v399_v36 = vsub.f32 2.0, %v398_v0 }
  0x68   :  { %v400_v38 = vmul.f32 %v512_v31, %v399_v36 }
  0x6a   :  { %v401_v39 = vmul.f32 %v400_v38, %v394_v35  ;;  %v403_v41 = vmul.f32 %v400_v38, %v400_v38 }
  0x6c   :  { %402 = vst [vmem:[%s888_s2] sm:$0x1] %v401_v39  ;;  %v404_v42 = vmul.f32 %v403_v41, %v395_v37 }
  0x6e   :  { %500 = vst [vmem:[%s888_s2 + $0x1] sm:$0x1] %v404_v42 }
  0x6f   :  { %413 = vsyncpa [#allocation3], 1 }

</bundles_post_ra>
